<compile_context>
chip_gen: v7x
topology: tpu7x:2x2x1
jax: 0.10.0
libtpu: 0.0.40
codegen_flags: <defaults>
</compile_context>

<pallas_src>
import jax
import jax.numpy as jnp
import numpy as np
from jax import lax
from jax.experimental import pallas as pl
from jax.experimental.pallas import tpu as pltpu


def contrastive_kernel(x_ref, w1_ref, b1_ref, w2_ref, b2_ref, o_ref):
    """One row tile of fc1 -> ReLU -> fc2 -> L2 normalize (dim=1).

    x_ref : (TILE_N, C_in)   activations (compute dtype, e.g. bf16)
    w1_ref: (C_in, C_in)     fc1 weight pre-transposed to (in, out)
    b1_ref: (1, C_in)        fc1 bias (f32)
    w2_ref: (C_in, C_out)    fc2 weight pre-transposed to (in, out)
    b2_ref: (1, C_out)       fc2 bias (f32)
    o_ref : (TILE_N, C_out)  output (input dtype)
    """
    x = x_ref[...]

    # fc1: plain (M,K)@(K,N) on the MXU; weights stored (in, out) so the
    # resident weight tile needs no relayout inside the grid loop.
    h = jnp.dot(x, w1_ref[...], preferred_element_type=jnp.float32)
    h = jnp.maximum(h + b1_ref[...], 0.0)            # bias + ReLU in f32

    # fc2
    y = jnp.dot(h.astype(w2_ref.dtype), w2_ref[...],
                preferred_element_type=jnp.float32)
    y = y + b2_ref[...]

    # F.normalize(y, dim=1): y / max(||y||, 1e-12) == y * rsqrt(max(||y||^2, 1e-24))
    # The cross-lane reduce rides the XLU slot and rsqrt the EUP slot -- both
    # idle next to the MXU-bound matmuls.
    ss = jnp.sum(y * y, axis=1, keepdims=True)
    inv = lax.rsqrt(jnp.maximum(ss, 1e-24))
    o_ref[...] = (y * inv).astype(o_ref.dtype)


def _vmem_limit_bytes(tile, c_in, c_out, act_bytes, out_bytes):
    """Working-set estimate (+30% headroom) for Mosaic's scoped VMEM limit."""
    resident = 2 * (c_in * c_in + c_in * c_out) * act_bytes   # w1^T, w2^T (dbl-buf)
    resident += 2 * (c_in + c_out) * 4                         # biases
    streamed = 2 * tile * c_in * act_bytes                     # x tile (dbl-buf)
    streamed += 2 * tile * c_out * out_bytes                   # out tile (dbl-buf)
    scratch = tile * (c_in + c_out) * 4                        # live f32 h / y
    total = int((resident + streamed + scratch) * 1.3)
    # Never below the common 32 MiB scoped default, never above v7x's 64 MiB/TC.
    return min(max(total, 32 * 1024 * 1024), 64 * 1024 * 1024)


def contrastive_layer(x, w1, b1, w2, b2, *, tile_n=512,
                      compute_dtype=jnp.bfloat16):
    """ContrastiveLayer forward: F.normalize(fc2(relu(fc1(x))), dim=1).

    x : (N, C_in).  Weights in torch nn.Linear (out, in) layout:
    w1 : (C_in, C_in), b1 : (C_in,), w2 : (C_out, C_in), b2 : (C_out,).
    Returns (N, C_out) in x.dtype.

    tile_n: rows per grid step.  512 amortizes the ~0.35us/step overhead and
    the two MXU fill/drains per step; the working set stays well inside every
    generation's per-TensorCore VMEM even at C_in=1024.
    compute_dtype: matmul-input dtype.  bf16 inputs + f32 accumulation give
    ~3-6x MXU throughput and halve HBM/VMEM traffic; pass jnp.float32 for a
    numerically tight path.
    """
    n, c_in = x.shape
    c_out, c_in2 = w2.shape
    assert c_in2 == c_in and w1.shape == (c_in, c_in)
    assert b1.shape == (c_in,) and b2.shape == (c_out,)
    # 16-row alignment keeps row tiles sublane-aligned for both f32 (8) and
    # packed bf16 (16).  A single full-dim tile (n <= tile_n) is exempt.
    assert tile_n > 0 and tile_n % 16 == 0, "tile_n must be a positive multiple of 16"

    # Full-dim row block when everything fits in one tile; otherwise tile_n-row
    # tiles with a ragged (masked) final block -- no HBM-side jnp.pad copy.
    tile = n if n <= tile_n else tile_n
    grid_n = pl.cdiv(n, tile)

    # One-time layout prep (a real deployment would store params this way):
    # weights transposed to (in, out) so the kernel contracts with a plain
    # jnp.dot and the resident weights never get re-relayouted per grid step.
    x_c = x.astype(compute_dtype)
    w1_t = jnp.transpose(w1).astype(compute_dtype)     # (C_in, C_in)  [in, out]
    w2_t = jnp.transpose(w2).astype(compute_dtype)     # (C_in, C_out) [in, out]
    b1_2d = b1.reshape(1, c_in).astype(jnp.float32)
    b2_2d = b2.reshape(1, c_out).astype(jnp.float32)

    act_bytes = jnp.dtype(compute_dtype).itemsize
    out_bytes = jnp.dtype(x.dtype).itemsize

    flops = 2 * n * c_in * (c_in + c_out)
    bytes_accessed = (n * c_in * act_bytes
                      + (c_in * c_in + c_in * c_out) * act_bytes
                      + (c_in + c_out) * 4
                      + n * c_out * out_bytes)

    # TODO(synk): if deployment C_out < 128, present a lane-dense output slab
    # ((N/k, k*C_out) row-major view) to avoid masked vst.msk partial stores.

    out = pl.pallas_call(
        contrastive_kernel,
        out_shape=jax.ShapeDtypeStruct((n, c_out), x.dtype),
        grid_spec=pltpu.PrefetchScalarGridSpec(
            num_scalar_prefetch=0,
            grid=(grid_n,),
            in_specs=[
                pl.BlockSpec((tile, c_in), lambda i: (i, 0)),    # x row tile
                pl.BlockSpec((c_in, c_in), lambda i: (0, 0)),    # w1^T (resident)
                pl.BlockSpec((1, c_in), lambda i: (0, 0)),       # b1   (resident)
                pl.BlockSpec((c_in, c_out), lambda i: (0, 0)),   # w2^T (resident)
                pl.BlockSpec((1, c_out), lambda i: (0, 0)),      # b2   (resident)
            ],
            out_specs=pl.BlockSpec((tile, c_out), lambda i: (i, 0)),
        ),
        compiler_params=pltpu.CompilerParams(
            # Row tiles are independent -> v7x's 2 TCs may split them (each TC
            # keeps its own resident copy of the small weights).
            dimension_semantics=("parallel",),
            vmem_limit_bytes=_vmem_limit_bytes(tile, c_in, c_out,
                                               act_bytes, out_bytes),
        ),
        cost_estimate=pl.CostEstimate(
            flops=flops, transcendentals=n, bytes_accessed=bytes_accessed),
    )(x_c, w1_t, b1_2d, w2_t, b2_2d)
    return out


def _torch_linear_init(key, out_features, in_features):
    """Deterministic stand-in for nn.Linear default init."""
    kw, kb = jax.random.split(key)
    bound = 1.0 / float(np.sqrt(in_features))
    w = jax.random.uniform(kw, (out_features, in_features),
                           minval=-bound, maxval=bound, dtype=jnp.float32)
    b = jax.random.uniform(kb, (out_features,),
                           minval=-bound, maxval=bound, dtype=jnp.float32)
    return w, b


def _reference_f64(x, w1, b1, w2, b2):
    """float64 numpy reference (independent of TPU matmul precision modes)."""
    x = np.asarray(x, np.float64)
    w1 = np.asarray(w1, np.float64); b1 = np.asarray(b1, np.float64)
    w2 = np.asarray(w2, np.float64); b2 = np.asarray(b2, np.float64)
    h = np.maximum(x @ w1.T + b1, 0.0)
    y = h @ w2.T + b2
    norm = np.sqrt((y * y).sum(axis=1, keepdims=True))
    return y / np.maximum(norm, 1e-12)


if __name__ == "__main__":
    key = jax.random.PRNGKey(0)
    k_x, k_fc1, k_fc2 = jax.random.split(key, 3)

    N, C_IN, C_OUT = 40, 32, 16   # small ROI-feature-like shapes
    x = jax.random.normal(k_x, (N, C_IN), dtype=jnp.float32)
    w1, b1 = _torch_linear_init(k_fc1, C_IN, C_IN)    # fc1: (Cin, Cin)
    w2, b2 = _torch_linear_init(k_fc2, C_OUT, C_IN)   # fc2: (Cout, Cin)

    ref = _reference_f64(x, w1, b1, w2, b2)

    # 1) f32 compute path, multi-tile with a ragged final block (40 rows, tile 16).
    out_f32 = jax.block_until_ready(
        contrastive_layer(x, w1, b1, w2, b2, tile_n=16,
                          compute_dtype=jnp.float32))
    assert out_f32.shape == (N, C_OUT)
    assert np.allclose(np.asarray(out_f32, np.float64), ref,
                       atol=1e-4, rtol=1e-4), "f32 tiled mismatch"

    # 2) default path: bf16 matmul inputs, f32 accumulation, single full-dim tile.
    out_bf16 = jax.block_until_ready(contrastive_layer(x, w1, b1, w2, b2))
    assert out_bf16.shape == (N, C_OUT)
    assert np.allclose(np.asarray(out_bf16, np.float64), ref,
                       atol=5e-2, rtol=5e-2), "bf16 mismatch"

    # 3) bf16 + multi-tile (exercises packed-sublane row tiles + ragged last block).
    out_bf16_t = jax.block_until_ready(
        contrastive_layer(x, w1, b1, w2, b2, tile_n=16))
    assert np.allclose(np.asarray(out_bf16_t, np.float64), ref,
                       atol=5e-2, rtol=5e-2), "bf16 tiled mismatch"

    print("KERNEL_OK")
</pallas_src>

<mosaic_0001>
module attributes {stable_mosaic.version = 11 : i64} {
  func.func @contrastive_kernel(%arg0: i32, %arg1: memref<16x32xf32, #tpu.memory_space<vmem>>, %arg2: memref<32x32xf32, #tpu.memory_space<vmem>>, %arg3: memref<1x32xf32, #tpu.memory_space<vmem>>, %arg4: memref<32x16xf32, #tpu.memory_space<vmem>>, %arg5: memref<1x16xf32, #tpu.memory_space<vmem>>, %arg6: memref<16x16xf32, #tpu.memory_space<vmem>>) attributes {dimension_semantics = [#tpu.dimension_semantics<parallel>], iteration_bounds = array<i64: 3>, scalar_prefetch = 0 : i64, scratch_operands = 0 : i64, tpu.core_type = #tpu.core_type<tc>, window_params = [{transform_indices = @transform_0, window_bounds = array<i64: 16, 32>}, {pipeline_mode = #tpu.pipeline_mode<synchronous>, transform_indices = @transform_1, window_bounds = array<i64: 32, 32>}, {pipeline_mode = #tpu.pipeline_mode<synchronous>, transform_indices = @transform_2, window_bounds = array<i64: 1, 32>}, {pipeline_mode = #tpu.pipeline_mode<synchronous>, transform_indices = @transform_3, window_bounds = array<i64: 32, 16>}, {pipeline_mode = #tpu.pipeline_mode<synchronous>, transform_indices = @transform_4, window_bounds = array<i64: 1, 16>}, {transform_indices = @transform_5, window_bounds = array<i64: 16, 16>}]} {
    %c0 = arith.constant 0 : index
    %c0_0 = arith.constant 0 : index
    %0 = vector.load %arg1[%c0, %c0_0] : memref<16x32xf32, #tpu.memory_space<vmem>>, vector<16x32xf32>
    %c0_1 = arith.constant 0 : index
    %c0_2 = arith.constant 0 : index
    %1 = vector.load %arg2[%c0_1, %c0_2] : memref<32x32xf32, #tpu.memory_space<vmem>>, vector<32x32xf32>
    %cst = arith.constant dense<0.000000e+00> : vector<16x32xf32>
    %2 = tpu.matmul %0, %1, %cst {dimension_numbers = #tpu.dot_dimension_numbers<[1], [0], [0], [1], [0, 0, 1, 1], [], []>} : vector<16x32xf32>, vector<32x32xf32>, vector<16x32xf32> -> vector<16x32xf32>
    %c0_3 = arith.constant 0 : index
    %c0_4 = arith.constant 0 : index
    %3 = vector.load %arg3[%c0_3, %c0_4] : memref<1x32xf32, #tpu.memory_space<vmem>>, vector<1x32xf32>
    %4 = vector.broadcast %3 : vector<1x32xf32> to vector<16x32xf32>
    %5 = arith.addf %2, %4 : vector<16x32xf32>
    %cst_5 = arith.constant 0.000000e+00 : f32
    %6 = vector.broadcast %cst_5 : f32 to vector<16x32xf32>
    %7 = arith.maximumf %5, %6 : vector<16x32xf32>
    %c0_6 = arith.constant 0 : index
    %c0_7 = arith.constant 0 : index
    %8 = vector.load %arg4[%c0_6, %c0_7] : memref<32x16xf32, #tpu.memory_space<vmem>>, vector<32x16xf32>
    %cst_8 = arith.constant dense<0.000000e+00> : vector<16x16xf32>
    %9 = tpu.matmul %7, %8, %cst_8 {dimension_numbers = #tpu.dot_dimension_numbers<[1], [0], [0], [1], [0, 0, 1, 1], [], []>} : vector<16x32xf32>, vector<32x16xf32>, vector<16x16xf32> -> vector<16x16xf32>
    %c0_9 = arith.constant 0 : index
    %c0_10 = arith.constant 0 : index
    %10 = vector.load %arg5[%c0_9, %c0_10] : memref<1x16xf32, #tpu.memory_space<vmem>>, vector<1x16xf32>
    %11 = vector.broadcast %10 : vector<1x16xf32> to vector<16x16xf32>
    %12 = arith.addf %9, %11 : vector<16x16xf32>
    %13 = arith.mulf %12, %12 : vector<16x16xf32>
    %cst_11 = arith.constant dense<0.000000e+00> : vector<16xf32>
    %14 = vector.multi_reduction <add>, %13, %cst_11 [1] : vector<16x16xf32> to vector<16xf32>
    %15 = vector.shape_cast %14 : vector<16xf32> to vector<16x1xf32>
    %cst_12 = arith.constant 1.000000e-24 : f32
    %16 = vector.broadcast %cst_12 : f32 to vector<16x1xf32>
    %17 = arith.maximumf %15, %16 : vector<16x1xf32>
    %18 = math.rsqrt %17 : vector<16x1xf32>
    %19 = vector.broadcast %18 : vector<16x1xf32> to vector<16x16xf32>
    %20 = arith.mulf %12, %19 : vector<16x16xf32>
    %c0_13 = arith.constant 0 : index
    %c0_14 = arith.constant 0 : index
    %21 = vector.load %arg6[%c0_13, %c0_14] : memref<16x16xf32, #tpu.memory_space<vmem>>, vector<16x16xf32>
    tpu.vector_store %arg6[%c0_13, %c0_14], %20 {strides = array<i32>} : memref<16x16xf32, #tpu.memory_space<vmem>>, vector<16x16xf32>,
    return
  }
  func.func @transform_0(%arg0: i32) -> (i32, i32) {
    %c0_i32 = arith.constant 0 : i32
    %c0_i32_0 = arith.constant 0 : i32
    return %arg0, %c0_i32 : i32, i32
  }
  func.func @transform_1(%arg0: i32) -> (i32, i32) {
    %c0_i32 = arith.constant 0 : i32
    %c0_i32_0 = arith.constant 0 : i32
    %c0_i32_1 = arith.constant 0 : i32
    return %c0_i32, %c0_i32_0 : i32, i32
  }
  func.func @transform_2(%arg0: i32) -> (i32, i32) {
    %c0_i32 = arith.constant 0 : i32
    %c0_i32_0 = arith.constant 0 : i32
    %c0_i32_1 = arith.constant 0 : i32
    return %c0_i32, %c0_i32_0 : i32, i32
  }
  func.func @transform_3(%arg0: i32) -> (i32, i32) {
    %c0_i32 = arith.constant 0 : i32
    %c0_i32_0 = arith.constant 0 : i32
    %c0_i32_1 = arith.constant 0 : i32
    return %c0_i32, %c0_i32_0 : i32, i32
  }
  func.func @transform_4(%arg0: i32) -> (i32, i32) {
    %c0_i32 = arith.constant 0 : i32
    %c0_i32_0 = arith.constant 0 : i32
    %c0_i32_1 = arith.constant 0 : i32
    return %c0_i32, %c0_i32_0 : i32, i32
  }
  func.func @transform_5(%arg0: i32) -> (i32, i32) {
    %c0_i32 = arith.constant 0 : i32
    %c0_i32_0 = arith.constant 0 : i32
    return %arg0, %c0_i32 : i32, i32
  }
}

</mosaic_0001>

<bundles_post_ra>
// kernel: tpu_custom_call.1
= control target key start
LH: loop header
LB: loop body
LE: loop exit
PB: predicated region body
PF: predicated region fallthrough
CT: control target
= control target key end

     0   :  { %s964_s18 = smov 0   ;;  %s966_s19 = smov 0   ;;  %s1085_s0 = inlined_call_operand.vmem [shape: f32[40,32], index: 0, kind: input, shape index: {}]   ;;  %s1086_s1 = inlined_call_operand.vmem [shape: f32[32,32], index: 1, kind: input, shape index: {}]   ;;  %s1087_s2 = inlined_call_operand.vmem [shape: f32[1,32], index: 2, kind: input, shape index: {}]   ;;  %s1088_s3 = inlined_call_operand.vmem [shape: f32[32,16], index: 3, kind: input, shape index: {}]   ;;  %s1089_s4 = inlined_call_operand.vmem [shape: f32[1,16], index: 4, kind: input, shape index: {}]   ;;  %s1090_s5 = inlined_call_operand.vmem [shape: f32[40,16], index: 5, kind: output, shape index: {}]  }
   0x1   :  { %s968_s20 = smov 0  }
   0x2 LB: > { %s977_s21 = sadd.s32 4294967295, %s900_s20   ;;  %s979_s22 = sadd.s32 1, %s900_s20   ;;  %s900_s20 = sphi %s968_s20, %s1094_s20   ;;  %s896_s19 = sphi %s966_s19, %s1093_s19   ;;  %s892_s18 = sphi %s964_s18, %s1092_s18  }
   0x3   : > { %s129_s23 = ssub.s32 %s900_s20, %s979_s22  ;;  %s132_s24 = sadd.s32 1, %s896_s19 }
   0x4   : > { %p130_p0 = scmp.eq.s32.totalorder %s129_s23, 0  ;;  %p142_p1 = scmp.ne.s32.totalorder %s896_s19, %s892_s18 }
   0x5   : > { %p143_p2 = scmp.eq.s32.totalorder %s977_s21, 2  ;;  %p674_p3 = scmp.ge.s32.totalorder %s900_s20, 1 }
   0x6   : > { %s987_s25 = scalar_select %p130_p0, %s896_s19, %s132_s24  }
   0x7   : > { %p989_p4 = por %p143_p2, %p142_p1  ;;  %p196_p5 = scmp.lt.s32.totalorder %s900_s20, 4 }
   0x9   : > { %p197_p6 = pnand %p674_p3, %p196_p5 }
   0xa   : > { %v248_v0 = vld [vmem:[%s1086_s1] sm:$0xff] (!%p197_p6)  ;;  %v249_v1 = vld [vmem:[%s1086_s1 + $0x8] sm:$0xff] (!%p197_p6)  ;;  %v250_v2 = vld [vmem:[%s1086_s1 + $0x10] sm:$0xff] (!%p197_p6)  ;;  %s1003_s8 = sshll.u32 (!%p197_p6), %s977_s21, 1  ;;  %vm259_vm0 = vcmask (!%p197_p6), 261120   ;;  %vm437_vm1 = vcmask (!%p197_p6), 130048  }
   0xb   : > { %200 = sbr.rel (%p197_p6) target bundleno = 671 (0x29f), region = 40  ;;  %v738_v3 = vpack.c.bf16 (!%p197_p6), %v249_v1, %v248_v0  ;;  %v251_v4 = vld [vmem:[%s1086_s1 + $0x18] sm:$0xff] (!%p197_p6)  ;;  %p232_p7 = scmp.lt.s32.totalorder (!%p197_p6), %s1003_s8, 4  ;;  %v343_v5 = vld [vmem:[%s1088_s3] sm:$0xff] (!%p197_p6)  ;;  %v344_v6 = vld [vmem:[%s1088_s3 + $0x8] sm:$0xff] (!%p197_p6) }
   0xc   : > { %v742_v7 = vpack.c.bf16 (!%p197_p6), %v251_v4, %v250_v2  ;;  %v746_v8 = vpack.c.bf16 (!%p197_p6), %v344_v6, %v343_v5  ;;  %v345_v11 = vld [vmem:[%s1088_s3 + $0x10] sm:$0xff] (!%p197_p6)  ;;  %v346_v12 = vld [vmem:[%s1088_s3 + $0x18] sm:$0xff] (!%p197_p6)  ;;  %v678_v14 = vld [vmem:[%s1087_s2] ss:$0 sm:$0xff] (!%p197_p6)  ;;  %s224_s10 = sand.u32 (!%p197_p6), 1, %s892_s18  }
   0xd   : > { %739 = vmatprep.subr.bf16.mxu0 (!%p197_p6), %v738_v3  ;;  %v750_v13 = vpack.c.bf16 (!%p197_p6), %v346_v12, %v345_v11  ;;  %v681_v21 = vld [vmem:[%s1089_s4] ss:$0 sm:$0xff] (!%p197_p6)  ;;  %s675_s11 = sshll.u32 (!%p197_p6), %s224_s10, 4 }
   0xe   : > { %741 = vmatpush3.bf16.msra.mxu0 (!%p197_p6), %v738_v3  ;;  %747 = vmatprep.subr.bf16.mxu1 (!%p197_p6), %v746_v8  ;;  %s1038_s12 = scalar_lea.vmem (!%p197_p6), [#allocation2], %s675_s11  }
   0xf   : > { %743 = vmatprep.subr.bf16.mxu0 (!%p197_p6), %v742_v7  ;;  %749 = vmatpush3.bf16.msra.mxu1 (!%p197_p6), %v746_v8 }
  0x10   : > { %751 = vmatprep.subr.bf16.mxu1 (!%p197_p6), %v750_v13 }
  0x12   : > { %s233_s15 = scalar_select %p232_p7, %s1003_s8, 4  ;;  %745 = vmatpush3.bf16.msra.mxu0 %v742_v7 }
  0x13   : > { %753 = vmatpush3.bf16.msra.mxu1 %v750_v13  ;;  %s460_s18 = ssub.s32 (%p989_p4), 5, %s1003_s8  ;;  %s701_s13 = sshll.u32 (%p989_p4), %s977_s21, 4 }
  0x14   : > { %s677_s16 = sshll.u32 %s233_s15, 3  ;;  %p461_p8 = scmp.lt.s32.totalorder (%p989_p4), %s460_s18, 2 }
  0x15   : > { %s235_s23 = scalar_lea.vmem %s1085_s0, %s677_s16  ;;  %s1051_s16 = scalar_lea.vmem (%p989_p4), %s1090_s5, %s701_s13  }
  0x16   : > { %v246_v9 = vld [vmem:[%s235_s23] sm:$0xff]  ;;  %v247_v10 = vld [vmem:[%s235_s23 + $0x8] sm:$0xff] }
  0x17   : > { %724 = vmatprep.mubr.msk.f32.mxu0 %vm259_vm0, %v246_v9 }
  0x18   : > { %725 = vmatmul.mubr.msk.f32.vlgmr.msra.gmra.mrb[0].mxu0 %vm259_vm0, %v247_v10 }
  0xeb   : > { %v726_v15 = vpop.f32.mrb[0].mxu0 }
  0xec   : > { %v338_v16 = vadd.f32 %v726_v15, %v678_v14  ;;  %v332_v17 = vpop.f32.mrb[1].mxu0 }
  0xed   : > { %v333_v18 = vadd.f32 %v678_v14, %v332_v17 }
  0xee   : > { %v342_v20 = vmax.f32 %v338_v16, 0.0 }
  0xef   : > { %v341_v19 = vmax.f32 %v333_v18, 0.0 }
  0xf1   : > { %735 = vmatprep.mubr.msk.f32.mxu1 %vm259_vm0, %v341_v19 }
  0xf2   : > { %736 = vmatmul.mubr.msk.f32.vlgmr.msra.gmra.mrb[0].mxu1 %vm259_vm0, %v342_v20 }
 0x1c5   : > { %v737_v22 = vpop.f32.mrb[0].mxu1 }
 0x1c6   : > { %v426_v23 = vpop.f32.mrb[1].mxu1  ;;  %v432_v24 = vadd.f32 %v737_v22, %v681_v21 }
 0x1c7   : > { %v427_v25 = vadd.f32 %v681_v21, %v426_v23 }
 0x1c8   : > { %v436_v28 = vmul.f32 %v432_v24, %v432_v24 }
 0x1c9   : > { %v435_v26 = vmul.f32 %v427_v25, %v427_v25 }
 0x1ca   : > { %v441_v29 = vsel %vm437_vm1, %v436_v28, 0.0 }
 0x1cb   : > { %v438_v27 = vsel %vm437_vm1, %v435_v26, 0.0 }
 0x1cc   : > { %439 = vadd.xlane.f32.xlu0 %v438_v27 }
 0x1d0   : > { %442 = vadd.xlane.f32.xlu0 %v441_v29 }
 0x259   : > { %v440_v30 = vpop.xlane.xlu0 %439 }
 0x25a   : > { %v444_v31 = vmax.f32 %v440_v30, 1e-24 }
 0x25c   : > { %842 = vrsqrt.f32 %v444_v31 }
 0x25d   : > { %v443_v32 = vpop.xlane.xlu0 %442 }
 0x25e   : > { %v445_v33 = vmax.f32 %v443_v32, 1e-24 }
 0x260   : > { %844 = vrsqrt.f32 %v445_v33 }
 0x266   : > { %v843_v34 = vpop.eup %842 }
 0x267   : > { %v448_v35 = vmul.f32 %v843_v34, %v427_v25  ;;  %458 = sbr.rel (!%p989_p4) target bundleno = 671 (0x29f), region = 44 }
 0x269   : > { %450 = vst.msk [vmem:[%s1038_s12] sm:$0xff] %vm437_vm1, %v448_v35 }
 0x26a   : > { %v845_v36 = vpop.eup %844 }
 0x26b   : > { %v449_v37 = vmul.f32 %v845_v36, %v432_v24 }
 0x26d   : > { %451 = vst.msk [vmem:[%s1038_s12 + $0x8] sm:$0xff] %vm437_vm1, %v449_v37 }
 0x26e   : > { %s1096_s18 = smov (!%p461_p8, %s460_s18), 2 }
 0x26f   : > { %s686_s17 = sshll.u32 %s1096_s18, 7 }
 0x270   : > { %p689_p9 = scmp.eq.s32.totalorder %s686_s17, 0 }
 0x271   : > { %s1057_s20 = sshrl.u32 (!%p689_p9), %s1096_s18, 1 }
 0x272   : > { %469 = sbr.rel (%p689_p9) target bundleno = 671 (0x29f), region = 48  ;;  %p690_p10 = scmp.le.s32.totalorder (!%p689_p9), %s1057_s20, 0 }
 0x279   : > { %627 = sbr.rel (%p690_p10) target bundleno = 650 (0x28a), region = 124  ;;  %s902_s21 = smov (!%p690_p10), %s1051_s16  }
 0x27a   : > { %s906_s26 = smov (!%p690_p10), %s1038_s12   ;;  %s910_s8 = smov (!%p690_p10), 0  }
 0x27b   : > { %s914_s23 = smov (!%p690_p10), 0  }
 0x280 LB: >> { %v533_v38 = vld [vmem:[%s908_s26] sm:$0xff]  ;;  %v535_v39 = vld [vmem:[%s908_s26 + $0x8] sm:$0xff]  ;;  %s537_s24 = sadd.s32 1, %s912_s8  ;;  %s527_s23 = sadd.s32 1, %s916_s23   ;;  %s916_s23 = sphi %s914_s23, %s527_s23   ;;  %s912_s8 = sphi %s910_s8, %s911_s8   ;;  %s908_s26 = sphi %s906_s26, %s542_s26   ;;  %s904_s21 = sphi %s902_s21, %s543_s21  }
 0x281   : >> { %534 = vst [vmem:[%s904_s21] sm:$0xff] %v533_v38  ;;  %536 = vst [vmem:[%s904_s21 + $0x8] sm:$0xff] %v535_v39  ;;  %p538_p11 = scmp.ge.s32.totalorder %s537_s24, %s1057_s20  ;;  %p526_p12 = scmp.ge.s32.totalorder %s527_s23, %s1057_s20 }
 0x283   : >> { %s1098_s24 = smov (%p538_p11, %s537_s24), 0  ;;  %529 = sbr.rel (!%p526_p12) target bundleno = 640 (0x280), region = 130 }
 0x284   : >> { %s691_s27 = sshll.u32 %s1098_s24, 4  ;;  %s911_s8 = smov %s1098_s24  }
 0x285   : >> { %s542_s26 = scalar_lea.vmem %s1038_s12, %s691_s27 [#allocation2]   ;;  %s543_s21 = scalar_lea.vmem %s1051_s16, %s691_s27  }
 0x28a PF: > { %s1067_s28 = sand.u32 1, %s1096_s18   ;;  %s702_s29 = sshll.u32 %s1057_s20, 4 }
 0x28b   : > { %s548_s30 = scalar_lea.vmem %s1038_s12, %s702_s29 [#allocation2]   ;;  %s550_s6 = scalar_lea.vmem %s1051_s16, %s702_s29  }
 0x28c   : > { %p696_p13 = scmp.le.s32.totalorder %s1067_s28, 0 }
 0x28d   : > { %s918_s7 = smov (!%p696_p13), %s550_s6   ;;  %s922_s9 = smov (!%p696_p13), %s548_s30  }
 0x28e   : > { %641 = sbr.rel (%p696_p13) target bundleno = 671 (0x29f), region = 135  ;;  %s926_s10 = smov (!%p696_p13), 0  }
 0x28f   : > { %s930_s11 = smov (!%p696_p13), 0  }
 0x295 LB: >> { %v560_v40 = vld [vmem:[%s924_s9] sm:$0xff]  ;;  %s562_s18 = sadd.s32 1, %s928_s10  ;;  %s554_s11 = sadd.s32 1, %s932_s11   ;;  %s932_s11 = sphi %s930_s11, %s554_s11   ;;  %s928_s10 = sphi %s926_s10, %s927_s10   ;;  %s924_s9 = sphi %s922_s9, %s567_s9   ;;  %s920_s7 = sphi %s918_s7, %s568_s7  }
 0x296   : >> { %561 = vst [vmem:[%s920_s7] sm:$0xff] %v560_v40  ;;  %p563_p0 = scmp.ge.s32.totalorder %s562_s18, %s1067_s28  ;;  %p553_p1 = scmp.ge.s32.totalorder %s554_s11, %s1067_s28 }
 0x298   : >> { %s1100_s18 = smov (%p563_p0, %s562_s18), 0  ;;  %556 = sbr.rel (!%p553_p1) target bundleno = 661 (0x295), region = 141 }
 0x299   : >> { %s697_s12 = sshll.u32 %s1100_s18, 3  ;;  %s927_s10 = smov %s1100_s18  }
 0x29a   : >> { %s567_s9 = scalar_lea.vmem %s548_s30, %s697_s12 [#allocation2]   ;;  %s568_s7 = scalar_lea.vmem %s550_s6, %s697_s12  }
 0x29f PF: > { %p12_p2 = scmp.ge.s32.totalorder %s979_s22, 5   ;;  %s1092_s18 = smov %s896_s19 }
 0x2a0   : > { %s1093_s19 = smov %s987_s25  ;;  %s1094_s20 = smov %s979_s22 }
 0x2a1   :  { %14 = sbr.rel (!%p12_p2) target bundleno = 2 (0x2), region = 152 }

</bundles_post_ra>
